<compile_context>
chip_gen: v6e
topology: v6e:2x2x1
jax: 0.10.0
libtpu: 0.0.40
codegen_flags: <defaults>
</compile_context>

<pallas_src>
import re

import jax
import jax.numpy as jnp
from jax.experimental import pallas as pl
from jax.experimental.pallas import tpu as pltpu


def _round_up(x, m):
    return (x + m - 1) // m * m


def _cdiv(a, b):
    return (a + b - 1) // b


def _tpu_generation():
    """Best-effort TPU generation (5, 6, 7, ...). Defaults to 6 if unknown."""
    try:
        kind = jax.devices()[0].device_kind.lower()
    except Exception:
        return 6
    m = re.search(r"v(\d+)", kind)
    return int(m.group(1)) if m else 6


def _make_kernel(n_extra, act_dtype):
    """Fused MLP kernel for one (TB, input_size) batch tile.

    Activations are batch-major (TB rows, features on lanes).  Every matmul is a plain
    (M,K)x(K,N) feed with the resident weight as the MXU-stationary RHS, so no in-kernel
    transposes are emitted.
    """

    def kernel(*refs):
        if n_extra > 0:
            x_ref, w1_ref, b1_ref, wh_ref, bh_ref, wo_ref, bo_ref, o_ref = refs
        else:
            x_ref, w1_ref, b1_ref, wo_ref, bo_ref, o_ref = refs

        # fc1: bf16 cast happens here on the VPU (x streams from HBM untouched).
        xb = x_ref[...].astype(jnp.bfloat16)                               # (TB, IN)
        h = jnp.dot(xb, w1_ref[...], preferred_element_type=jnp.float32)   # (TB, H) f32
        h = jnp.maximum(h + b1_ref[...], 0.0).astype(act_dtype)
        # TODO(synk): nn.Dropout is identity at inference time; intentionally omitted.

        # Extra hidden layers: bf16 MXU inputs, f32 accumulate; the cast back to
        # act_dtype (bf16 on v6e/v7x, f32 on v5e) is fused into the bias+ReLU epilogue.
        for i in range(n_extra):
            a = jnp.dot(h.astype(jnp.bfloat16), wh_ref[i],
                        preferred_element_type=jnp.float32)                # (TB, H) f32
            h = jnp.maximum(a + bh_ref[i], 0.0).astype(act_dtype)

        # fc_out (hidden -> 1): VPU multiply + lane reduce instead of a 1-wide matmul.
        logit = jnp.sum(h.astype(jnp.float32) * wo_ref[...], axis=1,
                        keepdims=True) + bo_ref[...]                       # (TB, 1) f32
        o_ref[...] = jax.nn.sigmoid(logit)

    return kernel


def fingerprint_dnn_forward(x, kparams, *, block_batch=None):
    """Run the fused MLP Pallas kernel.

    x: (batch, input_size), float32 or bfloat16 -- streamed as-is (no wrapper copy).
    kparams: dict from prepare_params():
        w1: (input_size, H) bf16   b1: (1, H) f32
        wh: (L-1, H, H) bf16       bh: (L-1, 1, H) f32
        wo: (1, H) f32             bo: (1, 1) f32
    block_batch: optional batch-tile override; by default derived from a generation-aware
        VMEM budget (sweepable ~2048-8192 on v5e/v6e, ~512-4096 on v7x).
    """
    batch, input_size = x.shape
    w1, b1 = kparams["w1"], kparams["b1"]
    wh, bh = kparams["wh"], kparams["bh"]
    wo, bo = kparams["wo"], kparams["bo"]
    if w1.shape[0] != input_size:
        raise ValueError("x feature dim does not match w1")
    H = w1.shape[1]
    n_extra = int(wh.shape[0])

    gen = _tpu_generation()
    # v5e has no bf16 VPU: keep inter-layer activations f32 there; bf16 elsewhere.
    act_dtype = jnp.float32 if gen <= 5 else jnp.bfloat16

    param_bytes = sum(int(a.size) * a.dtype.itemsize for a in (w1, b1, wh, bh, wo, bo))
    x_itemsize = x.dtype.itemsize

    # Per-batch-row VMEM cost: double-buffered x tile + ~3 live copies of h + output.
    per_row = 2 * input_size * x_itemsize + 3 * H * 4 + 16

    if block_batch is None:
        budget = (32 if gen >= 7 else 64) * 1024 * 1024   # v7x: 64 MiB physical VMEM
        avail = budget - 2 * param_bytes
        block_batch = max(128, min(8192, (avail // per_row) // 128 * 128))
    TB = int(block_batch)

    # v7x has 2 TensorCores sharing the "parallel" grid: keep >= 4 grid steps so both
    # cores get work.  (If a trace shows one core idle, switch to pltpu.CORE_PARALLEL.)
    if gen >= 7 and batch > 4 * 128:
        TB = min(TB, max(128, _round_up(_cdiv(batch, 4), 128)))

    if TB >= batch:
        TB = batch                        # single full-extent block: always layout-legal
    else:
        TB = max(128, TB // 128 * 128)    # keep tiled blocks sublane/lane aligned
    grid = (_cdiv(batch, TB),)            # ragged last block is masked by Pallas

    cost = pl.CostEstimate(
        flops=2 * batch * (input_size * H + n_extra * H * H + H),
        transcendentals=batch,
        bytes_accessed=int(x.size) * x_itemsize + param_bytes + batch * 4,
    )

    est_vmem = TB * per_row + 2 * param_bytes
    vmem_cap = (56 if gen >= 7 else 110) * 1024 * 1024
    vmem_limit = int(min(vmem_cap, max(32 * 1024 * 1024, int(1.3 * est_vmem))))

    def build_and_run(single_buffer):
        def resident(arr):
            shape = arr.shape
            imap = (lambda i: (0, 0)) if len(shape) == 2 else (lambda i: (0, 0, 0))
            if single_buffer:
                # Constant index map -> a single VMEM buffer suffices (halves resident VMEM).
                return pl.BlockSpec(shape, imap, pipeline_mode=pl.Buffered(1))
            return pl.BlockSpec(shape, imap)

        in_specs = [pl.BlockSpec((TB, input_size), lambda i: (i, 0))]  # x: tiled, 2-buffered
        args = [x]
        in_specs += [resident(w1), resident(b1)]
        args += [w1, b1]
        if n_extra > 0:
            in_specs += [resident(wh), resident(bh)]
            args += [wh, bh]
        in_specs += [resident(wo), resident(bo)]
        args += [wo, bo]

        return pl.pallas_call(
            _make_kernel(n_extra, act_dtype),
            out_shape=jax.ShapeDtypeStruct((batch, 1), jnp.float32),
            grid_spec=pltpu.PrefetchScalarGridSpec(
                num_scalar_prefetch=0,
                grid=grid,
                in_specs=in_specs,
                out_specs=pl.BlockSpec((TB, 1), lambda i: (i, 0)),
            ),
            compiler_params=pltpu.CompilerParams(
                dimension_semantics=("parallel",),   # batch tiles are independent
                vmem_limit_bytes=vmem_limit,
            ),
            cost_estimate=cost,
        )(*args)

    try:
        return build_and_run(single_buffer=True)
    except Exception:
        # pl.Buffered(1) / pipeline_mode unsupported by this jax version: fall back to the
        # default double-buffered resident weights (identical results, slightly more VMEM).
        return build_and_run(single_buffer=False)


def init_params(key, input_size, hidden_nodes, hidden_layers):
    """Logical (PyTorch-shaped, f32) parameters with nn.Linear-style uniform init."""
    ks = jax.random.split(key, 6)
    s1 = float(1.0 / (input_size ** 0.5))
    sh = float(1.0 / (hidden_nodes ** 0.5))
    n_extra = hidden_layers - 1
    return {
        "w1": jax.random.uniform(ks[0], (hidden_nodes, input_size), jnp.float32, -s1, s1),
        "b1": jax.random.uniform(ks[1], (hidden_nodes,), jnp.float32, -s1, s1),
        "wh": jax.random.uniform(ks[2], (n_extra, hidden_nodes, hidden_nodes),
                                 jnp.float32, -sh, sh),
        "bh": jax.random.uniform(ks[3], (n_extra, hidden_nodes), jnp.float32, -sh, sh),
        "wo": jax.random.uniform(ks[4], (hidden_nodes,), jnp.float32, -sh, sh),
        "bo": jax.random.uniform(ks[5], (), jnp.float32, -sh, sh),
    }


def prepare_params(p):
    """Kernel-layout params: weights pre-transposed to (K, N) for plain (M,K)x(K,N) MXU
    feeds and cast to bf16; biases as broadcastable f32 rows.  No feature padding."""
    return {
        "w1": jnp.transpose(p["w1"]).astype(jnp.bfloat16),             # (IN, H)
        "b1": p["b1"][None, :].astype(jnp.float32),                    # (1, H)
        "wh": jnp.transpose(p["wh"], (0, 2, 1)).astype(jnp.bfloat16),  # (L-1, H, H)
        "bh": p["bh"][:, None, :].astype(jnp.float32),                 # (L-1, 1, H)
        "wo": p["wo"][None, :].astype(jnp.float32),                    # (1, H)
        "bo": p["bo"].reshape(1, 1).astype(jnp.float32),               # (1, 1)
    }


def _reference_forward(x, p, *, quantized=False, act_dtype=jnp.float32):
    """Pure-JAX reference.  quantized=True mirrors the kernel numerics (bf16-rounded MXU
    inputs, f32 accumulation, act_dtype inter-layer activations)."""
    def q(a):
        return a.astype(jnp.bfloat16).astype(jnp.float32) if quantized else a

    def act(h):
        h = jnp.maximum(h, 0.0)
        return h.astype(act_dtype).astype(jnp.float32) if quantized else h

    h = act(q(x) @ q(p["w1"]).T + p["b1"])
    for i in range(p["wh"].shape[0]):
        h = act(q(h) @ q(p["wh"][i]).T + p["bh"][i])
    return jax.nn.sigmoid(h @ p["wo"][:, None] + p["bo"])


if __name__ == "__main__":
    # Small shapes consistent with the module: fingerprint vector -> scalar probability.
    batch = 8
    input_size = 64
    hidden_nodes = 32
    hidden_layers = 3          # fc1 + 2 extra hidden layers + fc_out
    dropout_rate = 0.5         # identity at inference (unused)

    key = jax.random.PRNGKey(0)
    kx, kp = jax.random.split(key)
    x = jax.random.normal(kx, (batch, input_size), jnp.float32)
    params = init_params(kp, input_size, hidden_nodes, hidden_layers)
    kparams = prepare_params(params)

    y = fingerprint_dnn_forward(x, kparams)
    y = jax.block_until_ready(y)
    assert y.shape == (batch, 1)

    # Loose sanity check against the full-f32 reference (guards gross errors).
    y_f32 = _reference_forward(x, params)
    assert float(jnp.max(jnp.abs(y - y_f32))) < 2e-2, "mismatch vs f32 reference"

    # Tight check against a reference that mirrors the kernel numerics exactly
    # (bf16 MXU inputs, f32 accumulate, generation-dependent activation dtype).
    act_dtype = jnp.float32 if _tpu_generation() <= 5 else jnp.bfloat16
    y_q = _reference_forward(x, params, quantized=True, act_dtype=act_dtype)
    assert float(jnp.max(jnp.abs(y - y_q))) < 1e-3, "mismatch vs quantized reference"

    print("KERNEL_OK")
</pallas_src>

<mosaic_0001>
module attributes {stable_mosaic.version = 11 : i64} {
  func.func @kernel(%arg0: i32, %arg1: memref<8x64xf32, #tpu.memory_space<vmem>>, %arg2: memref<64x32xbf16, #tpu.memory_space<vmem>>, %arg3: memref<1x32xf32, #tpu.memory_space<vmem>>, %arg4: memref<2x32x32xbf16, #tpu.memory_space<vmem>>, %arg5: memref<2x1x32xf32, #tpu.memory_space<vmem>>, %arg6: memref<1x32xf32, #tpu.memory_space<vmem>>, %arg7: memref<1x1xf32, #tpu.memory_space<vmem>>, %arg8: memref<8x1xf32, #tpu.memory_space<vmem>>) attributes {dimension_semantics = [#tpu.dimension_semantics<parallel>], iteration_bounds = array<i64: 1>, scalar_prefetch = 0 : i64, scratch_operands = 0 : i64, tpu.core_type = #tpu.core_type<tc>, window_params = [{transform_indices = @transform_0, window_bounds = array<i64: 8, 64>}, {pipeline_mode = #tpu.pipeline_mode<synchronous>, transform_indices = @transform_1, window_bounds = array<i64: 64, 32>}, {pipeline_mode = #tpu.pipeline_mode<synchronous>, transform_indices = @transform_2, window_bounds = array<i64: 1, 32>}, {pipeline_mode = #tpu.pipeline_mode<synchronous>, transform_indices = @transform_3, window_bounds = array<i64: 2, 32, 32>}, {pipeline_mode = #tpu.pipeline_mode<synchronous>, transform_indices = @transform_4, window_bounds = array<i64: 2, 1, 32>}, {pipeline_mode = #tpu.pipeline_mode<synchronous>, transform_indices = @transform_5, window_bounds = array<i64: 1, 32>}, {pipeline_mode = #tpu.pipeline_mode<synchronous>, transform_indices = @transform_6, window_bounds = array<i64: 1, 1>}, {transform_indices = @transform_7, window_bounds = array<i64: 8, 1>}]} {
    %c0 = arith.constant 0 : index
    %c0_0 = arith.constant 0 : index
    %0 = vector.load %arg1[%c0, %c0_0] : memref<8x64xf32, #tpu.memory_space<vmem>>, vector<8x64xf32>
    %1 = arith.truncf %0 : vector<8x64xf32> to vector<8x64xbf16>
    %c0_1 = arith.constant 0 : index
    %c0_2 = arith.constant 0 : index
    %2 = vector.load %arg2[%c0_1, %c0_2] : memref<64x32xbf16, #tpu.memory_space<vmem>>, vector<64x32xbf16>
    %cst = arith.constant dense<0.000000e+00> : vector<8x32xf32>
    %3 = tpu.matmul %1, %2, %cst {dimension_numbers = #tpu.dot_dimension_numbers<[1], [0], [0], [1], [0, 0, 1, 1], [], []>} : vector<8x64xbf16>, vector<64x32xbf16>, vector<8x32xf32> -> vector<8x32xf32>
    %c0_3 = arith.constant 0 : index
    %c0_4 = arith.constant 0 : index
    %4 = vector.load %arg3[%c0_3, %c0_4] : memref<1x32xf32, #tpu.memory_space<vmem>>, vector<1x32xf32>
    %5 = vector.broadcast %4 : vector<1x32xf32> to vector<8x32xf32>
    %6 = arith.addf %3, %5 : vector<8x32xf32>
    %cst_5 = arith.constant 0.000000e+00 : f32
    %7 = vector.broadcast %cst_5 : f32 to vector<8x32xf32>
    %8 = arith.maximumf %6, %7 : vector<8x32xf32>
    %9 = arith.truncf %8 : vector<8x32xf32> to vector<8x32xbf16>
    %c0_6 = arith.constant 0 : index
    %c0_7 = arith.constant 0 : index
    %c0_8 = arith.constant 0 : index
    %10 = vector.load %arg4[%c0_6, %c0_7, %c0_8] : memref<2x32x32xbf16, #tpu.memory_space<vmem>>, vector<1x32x32xbf16>
    %11 = vector.shape_cast %10 : vector<1x32x32xbf16> to vector<32x32xbf16>
    %cst_9 = arith.constant dense<0.000000e+00> : vector<8x32xf32>
    %12 = tpu.matmul %9, %11, %cst_9 {dimension_numbers = #tpu.dot_dimension_numbers<[1], [0], [0], [1], [0, 0, 1, 1], [], []>} : vector<8x32xbf16>, vector<32x32xbf16>, vector<8x32xf32> -> vector<8x32xf32>
    %c0_10 = arith.constant 0 : index
    %c0_11 = arith.constant 0 : index
    %c0_12 = arith.constant 0 : index
    %13 = vector.load %arg5[%c0_10, %c0_11, %c0_12] : memref<2x1x32xf32, #tpu.memory_space<vmem>>, vector<1x1x32xf32>
    %14 = vector.shape_cast %13 : vector<1x1x32xf32> to vector<1x32xf32>
    %15 = vector.broadcast %14 : vector<1x32xf32> to vector<8x32xf32>
    %16 = arith.addf %12, %15 : vector<8x32xf32>
    %cst_13 = arith.constant 0.000000e+00 : f32
    %17 = vector.broadcast %cst_13 : f32 to vector<8x32xf32>
    %18 = arith.maximumf %16, %17 : vector<8x32xf32>
    %19 = arith.truncf %18 : vector<8x32xf32> to vector<8x32xbf16>
    %c1 = arith.constant 1 : index
    %c0_14 = arith.constant 0 : index
    %c0_15 = arith.constant 0 : index
    %20 = vector.load %arg4[%c1, %c0_14, %c0_15] : memref<2x32x32xbf16, #tpu.memory_space<vmem>>, vector<1x32x32xbf16>
    %21 = vector.shape_cast %20 : vector<1x32x32xbf16> to vector<32x32xbf16>
    %cst_16 = arith.constant dense<0.000000e+00> : vector<8x32xf32>
    %22 = tpu.matmul %19, %21, %cst_16 {dimension_numbers = #tpu.dot_dimension_numbers<[1], [0], [0], [1], [0, 0, 1, 1], [], []>} : vector<8x32xbf16>, vector<32x32xbf16>, vector<8x32xf32> -> vector<8x32xf32>
    %c1_17 = arith.constant 1 : index
    %c0_18 = arith.constant 0 : index
    %c0_19 = arith.constant 0 : index
    %23 = vector.load %arg5[%c1_17, %c0_18, %c0_19] : memref<2x1x32xf32, #tpu.memory_space<vmem>>, vector<1x1x32xf32>
    %24 = vector.shape_cast %23 : vector<1x1x32xf32> to vector<1x32xf32>
    %25 = vector.broadcast %24 : vector<1x32xf32> to vector<8x32xf32>
    %26 = arith.addf %22, %25 : vector<8x32xf32>
    %cst_20 = arith.constant 0.000000e+00 : f32
    %27 = vector.broadcast %cst_20 : f32 to vector<8x32xf32>
    %28 = arith.maximumf %26, %27 : vector<8x32xf32>
    %29 = arith.truncf %28 : vector<8x32xf32> to vector<8x32xbf16>
    %30 = arith.extf %29 : vector<8x32xbf16> to vector<8x32xf32>
    %c0_21 = arith.constant 0 : index
    %c0_22 = arith.constant 0 : index
    %31 = vector.load %arg6[%c0_21, %c0_22] : memref<1x32xf32, #tpu.memory_space<vmem>>, vector<1x32xf32>
    %32 = vector.broadcast %31 : vector<1x32xf32> to vector<8x32xf32>
    %33 = arith.mulf %30, %32 : vector<8x32xf32>
    %cst_23 = arith.constant dense<0.000000e+00> : vector<8xf32>
    %34 = vector.multi_reduction <add>, %33, %cst_23 [1] : vector<8x32xf32> to vector<8xf32>
    %35 = vector.shape_cast %34 : vector<8xf32> to vector<8x1xf32>
    %c0_24 = arith.constant 0 : index
    %c0_25 = arith.constant 0 : index
    %36 = vector.load %arg7[%c0_24, %c0_25] : memref<1x1xf32, #tpu.memory_space<vmem>>, vector<1x1xf32>
    %37 = vector.broadcast %36 : vector<1x1xf32> to vector<8x1xf32>
    %38 = arith.addf %35, %37 : vector<8x1xf32>
    %39 = arith.negf %38 : vector<8x1xf32>
    %40 = math.exp %39 : vector<8x1xf32>
    %cst_26 = arith.constant 1.000000e+00 : f32
    %41 = vector.broadcast %cst_26 : f32 to vector<8x1xf32>
    %42 = arith.addf %41, %40 : vector<8x1xf32>
    %43 = arith.divf %41, %42 : vector<8x1xf32>
    %c0_27 = arith.constant 0 : index
    %c0_28 = arith.constant 0 : index
    %44 = vector.load %arg8[%c0_27, %c0_28] : memref<8x1xf32, #tpu.memory_space<vmem>>, vector<8x1xf32>
    tpu.vector_store %arg8[%c0_27, %c0_28], %43 {strides = array<i32>} : memref<8x1xf32, #tpu.memory_space<vmem>>, vector<8x1xf32>,
    return
  }
  func.func @transform_0(%arg0: i32) -> (i32, i32) {
    %c0_i32 = arith.constant 0 : i32
    %c0_i32_0 = arith.constant 0 : i32
    return %arg0, %c0_i32 : i32, i32
  }
  func.func @transform_1(%arg0: i32) -> (i32, i32) {
    %c0_i32 = arith.constant 0 : i32
    %c0_i32_0 = arith.constant 0 : i32
    %c0_i32_1 = arith.constant 0 : i32
    return %c0_i32, %c0_i32_0 : i32, i32
  }
  func.func @transform_2(%arg0: i32) -> (i32, i32) {
    %c0_i32 = arith.constant 0 : i32
    %c0_i32_0 = arith.constant 0 : i32
    %c0_i32_1 = arith.constant 0 : i32
    return %c0_i32, %c0_i32_0 : i32, i32
  }
  func.func @transform_3(%arg0: i32) -> (i32, i32, i32) {
    %c0_i32 = arith.constant 0 : i32
    %c0_i32_0 = arith.constant 0 : i32
    %c0_i32_1 = arith.constant 0 : i32
    %c0_i32_2 = arith.constant 0 : i32
    return %c0_i32, %c0_i32_0, %c0_i32_1 : i32, i32, i32
  }
  func.func @transform_4(%arg0: i32) -> (i32, i32, i32) {
    %c0_i32 = arith.constant 0 : i32
    %c0_i32_0 = arith.constant 0 : i32
    %c0_i32_1 = arith.constant 0 : i32
    %c0_i32_2 = arith.constant 0 : i32
    return %c0_i32, %c0_i32_0, %c0_i32_1 : i32, i32, i32
  }
  func.func @transform_5(%arg0: i32) -> (i32, i32) {
    %c0_i32 = arith.constant 0 : i32
    %c0_i32_0 = arith.constant 0 : i32
    %c0_i32_1 = arith.constant 0 : i32
    return %c0_i32, %c0_i32_0 : i32, i32
  }
  func.func @transform_6(%arg0: i32) -> (i32, i32) {
    %c0_i32 = arith.constant 0 : i32
    %c0_i32_0 = arith.constant 0 : i32
    %c0_i32_1 = arith.constant 0 : i32
    return %c0_i32, %c0_i32_0 : i32, i32
  }
  func.func @transform_7(%arg0: i32) -> (i32, i32) {
    %c0_i32 = arith.constant 0 : i32
    %c0_i32_0 = arith.constant 0 : i32
    return %arg0, %c0_i32 : i32, i32
  }
}

module attributes {stable_mosaic.version = 11 : i64} {
  func.func @kernel(%arg0: i32, %arg1: memref<8x64xf32, #tpu.memory_space<vmem>>, %arg2: memref<64x32xbf16, #tpu.memory_space<vmem>>, %arg3: memref<1x32xf32, #tpu.memory_space<vmem>>, %arg4: memref<2x32x32xbf16, #tpu.memory_space<vmem>>, %arg5: memref<2x1x32xf32, #tpu.memory_space<vmem>>, %arg6: memref<1x32xf32, #tpu.memory_space<vmem>>, %arg7: memref<1x1xf32, #tpu.memory_space<vmem>>, %arg8: memref<8x1xf32, #tpu.memory_space<vmem>>) attributes {dimension_semantics = [#tpu.dimension_semantics<parallel>], iteration_bounds = array<i64: 1>, scalar_prefetch = 0 : i64, scratch_operands = 0 : i64, tpu.core_type = #tpu.core_type<tc>, window_params = [{transform_indices = @transform_0, window_bounds = array<i64: 8, 64>}, {pipeline_mode = #tpu.pipeline_mode<synchronous>, transform_indices = @transform_1, window_bounds = array<i64: 64, 32>}, {pipeline_mode = #tpu.pipeline_mode<synchronous>, transform_indices = @transform_2, window_bounds = array<i64: 1, 32>}, {pipeline_mode = #tpu.pipeline_mode<synchronous>, transform_indices = @transform_3, window_bounds = array<i64: 2, 32, 32>}, {pipeline_mode = #tpu.pipeline_mode<synchronous>, transform_indices = @transform_4, window_bounds = array<i64: 2, 1, 32>}, {pipeline_mode = #tpu.pipeline_mode<synchronous>, transform_indices = @transform_5, window_bounds = array<i64: 1, 32>}, {pipeline_mode = #tpu.pipeline_mode<synchronous>, transform_indices = @transform_6, window_bounds = array<i64: 1, 1>}, {transform_indices = @transform_7, window_bounds = array<i64: 8, 1>}]} {
    %c0 = arith.constant 0 : index
    %c0_0 = arith.constant 0 : index
    %0 = vector.load %arg1[%c0, %c0_0] : memref<8x64xf32, #tpu.memory_space<vmem>>, vector<8x64xf32>
    %1 = arith.truncf %0 : vector<8x64xf32> to vector<8x64xbf16>
    %c0_1 = arith.constant 0 : index
    %c0_2 = arith.constant 0 : index
    %2 = vector.load %arg2[%c0_1, %c0_2] : memref<64x32xbf16, #tpu.memory_space<vmem>>, vector<64x32xbf16>
    %cst = arith.constant dense<0.000000e+00> : vector<8x32xf32>
    %3 = tpu.matmul %1, %2, %cst {dimension_numbers = #tpu.dot_dimension_numbers<[1], [0], [0], [1], [0, 0, 1, 1], [], []>} : vector<8x64xbf16>, vector<64x32xbf16>, vector<8x32xf32> -> vector<8x32xf32>
    %c0_3 = arith.constant 0 : index
    %c0_4 = arith.constant 0 : index
    %4 = vector.load %arg3[%c0_3, %c0_4] : memref<1x32xf32, #tpu.memory_space<vmem>>, vector<1x32xf32>
    %5 = vector.broadcast %4 : vector<1x32xf32> to vector<8x32xf32>
    %6 = arith.addf %3, %5 : vector<8x32xf32>
    %cst_5 = arith.constant 0.000000e+00 : f32
    %7 = vector.broadcast %cst_5 : f32 to vector<8x32xf32>
    %8 = arith.maximumf %6, %7 : vector<8x32xf32>
    %9 = arith.truncf %8 : vector<8x32xf32> to vector<8x32xbf16>
    %c0_6 = arith.constant 0 : index
    %c0_7 = arith.constant 0 : index
    %c0_8 = arith.constant 0 : index
    %10 = vector.load %arg4[%c0_6, %c0_7, %c0_8] : memref<2x32x32xbf16, #tpu.memory_space<vmem>>, vector<1x32x32xbf16>
    %11 = vector.shape_cast %10 : vector<1x32x32xbf16> to vector<32x32xbf16>
    %cst_9 = arith.constant dense<0.000000e+00> : vector<8x32xf32>
    %12 = tpu.matmul %9, %11, %cst_9 {dimension_numbers = #tpu.dot_dimension_numbers<[1], [0], [0], [1], [0, 0, 1, 1], [], []>} : vector<8x32xbf16>, vector<32x32xbf16>, vector<8x32xf32> -> vector<8x32xf32>
    %c0_10 = arith.constant 0 : index
    %c0_11 = arith.constant 0 : index
    %c0_12 = arith.constant 0 : index
    %13 = vector.load %arg5[%c0_10, %c0_11, %c0_12] : memref<2x1x32xf32, #tpu.memory_space<vmem>>, vector<1x1x32xf32>
    %14 = vector.shape_cast %13 : vector<1x1x32xf32> to vector<1x32xf32>
    %15 = vector.broadcast %14 : vector<1x32xf32> to vector<8x32xf32>
    %16 = arith.addf %12, %15 : vector<8x32xf32>
    %cst_13 = arith.constant 0.000000e+00 : f32
    %17 = vector.broadcast %cst_13 : f32 to vector<8x32xf32>
    %18 = arith.maximumf %16, %17 : vector<8x32xf32>
    %19 = arith.truncf %18 : vector<8x32xf32> to vector<8x32xbf16>
    %c1 = arith.constant 1 : index
    %c0_14 = arith.constant 0 : index
    %c0_15 = arith.constant 0 : index
    %20 = vector.load %arg4[%c1, %c0_14, %c0_15] : memref<2x32x32xbf16, #tpu.memory_space<vmem>>, vector<1x32x32xbf16>
    %21 = vector.shape_cast %20 : vector<1x32x32xbf16> to vector<32x32xbf16>
    %cst_16 = arith.constant dense<0.000000e+00> : vector<8x32xf32>
    %22 = tpu.matmul %19, %21, %cst_16 {dimension_numbers = #tpu.dot_dimension_numbers<[1], [0], [0], [1], [0, 0, 1, 1], [], []>} : vector<8x32xbf16>, vector<32x32xbf16>, vector<8x32xf32> -> vector<8x32xf32>
    %c1_17 = arith.constant 1 : index
    %c0_18 = arith.constant 0 : index
    %c0_19 = arith.constant 0 : index
    %23 = vector.load %arg5[%c1_17, %c0_18, %c0_19] : memref<2x1x32xf32, #tpu.memory_space<vmem>>, vector<1x1x32xf32>
    %24 = vector.shape_cast %23 : vector<1x1x32xf32> to vector<1x32xf32>
    %25 = vector.broadcast %24 : vector<1x32xf32> to vector<8x32xf32>
    %26 = arith.addf %22, %25 : vector<8x32xf32>
    %cst_20 = arith.constant 0.000000e+00 : f32
    %27 = vector.broadcast %cst_20 : f32 to vector<8x32xf32>
    %28 = arith.maximumf %26, %27 : vector<8x32xf32>
    %29 = arith.truncf %28 : vector<8x32xf32> to vector<8x32xbf16>
    %30 = arith.extf %29 : vector<8x32xbf16> to vector<8x32xf32>
    %c0_21 = arith.constant 0 : index
    %c0_22 = arith.constant 0 : index
    %31 = vector.load %arg6[%c0_21, %c0_22] : memref<1x32xf32, #tpu.memory_space<vmem>>, vector<1x32xf32>
    %32 = vector.broadcast %31 : vector<1x32xf32> to vector<8x32xf32>
    %33 = arith.mulf %30, %32 : vector<8x32xf32>
    %cst_23 = arith.constant dense<0.000000e+00> : vector<8xf32>
    %34 = vector.multi_reduction <add>, %33, %cst_23 [1] : vector<8x32xf32> to vector<8xf32>
    %35 = vector.shape_cast %34 : vector<8xf32> to vector<8x1xf32>
    %c0_24 = arith.constant 0 : index
    %c0_25 = arith.constant 0 : index
    %36 = vector.load %arg7[%c0_24, %c0_25] : memref<1x1xf32, #tpu.memory_space<vmem>>, vector<1x1xf32>
    %37 = vector.broadcast %36 : vector<1x1xf32> to vector<8x1xf32>
    %38 = arith.addf %35, %37 : vector<8x1xf32>
    %39 = arith.negf %38 : vector<8x1xf32>
    %40 = math.exp %39 : vector<8x1xf32>
    %cst_26 = arith.constant 1.000000e+00 : f32
    %41 = vector.broadcast %cst_26 : f32 to vector<8x1xf32>
    %42 = arith.addf %41, %40 : vector<8x1xf32>
    %43 = arith.divf %41, %42 : vector<8x1xf32>
    %c0_27 = arith.constant 0 : index
    %c0_28 = arith.constant 0 : index
    %44 = vector.load %arg8[%c0_27, %c0_28] : memref<8x1xf32, #tpu.memory_space<vmem>>, vector<8x1xf32>
    tpu.vector_store %arg8[%c0_27, %c0_28], %43 {strides = array<i32>} : memref<8x1xf32, #tpu.memory_space<vmem>>, vector<8x1xf32>,
    return
  }
  func.func @transform_0(%arg0: i32) -> (i32, i32) {
    %c0_i32 = arith.constant 0 : i32
    %c0_i32_0 = arith.constant 0 : i32
    return %arg0, %c0_i32 : i32, i32
  }
  func.func @transform_1(%arg0: i32) -> (i32, i32) {
    %c0_i32 = arith.constant 0 : i32
    %c0_i32_0 = arith.constant 0 : i32
    %c0_i32_1 = arith.constant 0 : i32
    return %c0_i32, %c0_i32_0 : i32, i32
  }
  func.func @transform_2(%arg0: i32) -> (i32, i32) {
    %c0_i32 = arith.constant 0 : i32
    %c0_i32_0 = arith.constant 0 : i32
    %c0_i32_1 = arith.constant 0 : i32
    return %c0_i32, %c0_i32_0 : i32, i32
  }
  func.func @transform_3(%arg0: i32) -> (i32, i32, i32) {
    %c0_i32 = arith.constant 0 : i32
    %c0_i32_0 = arith.constant 0 : i32
    %c0_i32_1 = arith.constant 0 : i32
    %c0_i32_2 = arith.constant 0 : i32
    return %c0_i32, %c0_i32_0, %c0_i32_1 : i32, i32, i32
  }
  func.func @transform_4(%arg0: i32) -> (i32, i32, i32) {
    %c0_i32 = arith.constant 0 : i32
    %c0_i32_0 = arith.constant 0 : i32
    %c0_i32_1 = arith.constant 0 : i32
    %c0_i32_2 = arith.constant 0 : i32
    return %c0_i32, %c0_i32_0, %c0_i32_1 : i32, i32, i32
  }
  func.func @transform_5(%arg0: i32) -> (i32, i32) {
    %c0_i32 = arith.constant 0 : i32
    %c0_i32_0 = arith.constant 0 : i32
    %c0_i32_1 = arith.constant 0 : i32
    return %c0_i32, %c0_i32_0 : i32, i32
  }
  func.func @transform_6(%arg0: i32) -> (i32, i32) {
    %c0_i32 = arith.constant 0 : i32
    %c0_i32_0 = arith.constant 0 : i32
    %c0_i32_1 = arith.constant 0 : i32
    return %c0_i32, %c0_i32_0 : i32, i32
  }
  func.func @transform_7(%arg0: i32) -> (i32, i32) {
    %c0_i32 = arith.constant 0 : i32
    %c0_i32_0 = arith.constant 0 : i32
    return %arg0, %c0_i32 : i32, i32
  }
}

</mosaic_0001>

<bundles_post_ra>
// kernel: tpu_custom_call.1
= control target key start
LH: loop header
LB: loop body
LE: loop exit
PB: predicated region body
PF: predicated region fallthrough
CT: control target
= control target key end

     0   :  { %v362_v0 = vmov 0.0   ;;  %vm363_vm0 = vmmov 0   ;;  %vm70_vm1 = vcmask 523264   ;;  %vm139_vm2 = vcmask 261120   ;;  %s455_s1 = inlined_call_operand.vmem [shape: bf16[64,32], index: 1, kind: input, shape index: {}]   ;;  %s456_s0 = inlined_call_operand.vmem [shape: f32[8,64], index: 0, kind: input, shape index: {}]   ;;  %s457_s3 = inlined_call_operand.vmem [shape: bf16[2,32,32], index: 3, kind: input, shape index: {}]   ;;  %s458_s2 = inlined_call_operand.vmem [shape: f32[1,32], index: 2, kind: input, shape index: {}]   ;;  %s459_s4 = inlined_call_operand.vmem [shape: f32[2,1,32], index: 4, kind: input, shape index: {}]   ;;  %s460_s6 = inlined_call_operand.<no memory space> [shape: f32[1,1], index: 6, kind: input, shape index: {}]   ;;  %s461_s5 = inlined_call_operand.vmem [shape: f32[1,32], index: 5, kind: input, shape index: {}]   ;;  %s462_s7 = inlined_call_operand.vmem [shape: f32[8,1], index: 7, kind: output, shape index: {}]  }
   0x1   :  { %320 = vmatprep.subr.bf16.mxu0 %v362_v0  ;;  %v350_v1 = vld [vmem:[%s455_s1 + $0x18] sm:$0xff]   ;;  %328 = vmatprep.mubr.msk.bf16.mxu0 %vm363_vm0, %v362_v0  ;;  %v351_v2 = vld [vmem:[%s455_s1 + $0x10] sm:$0xff]   ;;  %v352_v3 = vld [vmem:[%s455_s1 + $0x8] sm:$0xff]   ;;  %v12_v27 = vstv %s460_s6  ;;  %vm281_vm3 = vcmask 7168  }
   0x2   :  { %332 = vmatprep.subr.bf16.mxu1 %v362_v0  ;;  %336 = vmatprep.mubr.msk.bf16.mxu1 %vm363_vm0, %v362_v0  ;;  %v353_v4 = vld [vmem:[%s455_s1] sm:$0xff]   ;;  %v354_v7 = vld [vmem:[%s457_s3 + $0x8] sm:$0xff]   ;;  %v356_v15 = vld [vmem:[%s457_s3 + $0x18] sm:$0xff]   ;;  %13 = vst [vmem:[#allocation2] sm:$0x1] %v12_v27 }
   0x3   :  { %321 = vmatpush3.bf16.msra.mxu0 %v350_v1  ;;  %v29_v5 = vld [vmem:[%s456_s0] sm:$0xff]  ;;  %333 = vmatpush3.bf16.msra.mxu1 %v354_v7  ;;  %v357_v18 = vld [vmem:[%s457_s3 + $0x10] sm:$0xff]  }
   0x4   :  { %322 = vmatprep.subr.bf16.mxu0 %v362_v0  ;;  %v30_v6 = vpack.c.bf16 %v29_v5, %v29_v5  ;;  %334 = vmatprep.subr.bf16.mxu1 %v362_v0  ;;  %v355_v8 = vld [vmem:[%s457_s3] sm:$0xff]  }
   0x5   :  { %v287_v9 = vld [vmem:[%s458_s2] ss:$0 sm:$0xff]  ;;  %v302_v28 = vld [vmem:[%s459_s4 + $0x1] ss:$0 sm:$0xff] }
   0x6   :  { %v293_v19 = vld [vmem:[%s459_s4] ss:$0 sm:$0xff] }
   0x7   :  { %323 = vmatpush3.bf16.msra.mxu0 %v351_v2  ;;  %335 = vmatpush3.bf16.msra.mxu1 %v355_v8  ;;  %v306_v36 = vld [vmem:[%s461_s5] ss:$0 sm:$0xff] }
   0x8   :  { %324 = vmatprep.subr.bf16.mxu0 %v362_v0  ;;  %340 = vmatprep.subr.bf16.mxu1 %v362_v0 }
   0x9   :  { %v307_v40 = vld [vmem:[#allocation2] ss:$0 sm:$0xff] }
   0xb   :  { %325 = vmatpush3.bf16.msra.mxu0 %v352_v3 }
   0xc   :  { %326 = vmatprep.subr.bf16.mxu0 %v362_v0 }
   0xf   :  { %327 = vmatpush3.bf16.msra.mxu0 %v353_v4 }
  0x12   :  { %329 = vmatmul.mubr.msk.bf16.vlgmr.msra.gmra.mxu0 %vm70_vm1, %v30_v6 }
  0xd2   :  { %v108_v10 = vpop.f32.mrf.mxu0 }
  0xd3   :  { %v109_v11 = vadd.f32 %v287_v9, %v108_v10 }
  0xd4   :  { %v330_v12 = vpop.f32.mrf.mxu0 }
  0xd5   :  { %v114_v13 = vmax.f32 %v109_v11, 0.0 }
  0xd6   :  { %v111_v14 = vpop.f32.mrf.mxu0 }
  0xd7   :  { %v115_v16 = vpack.c.bf16 %v114_v13, %v114_v13 }
  0xd8   :  { %v331_v17 = vpop.f32.mrf.mxu0 }
  0xd9   :  { %337 = vmatmul.mubr.msk.bf16.vlgmr.msra.gmra.mxu1 %vm139_vm2, %v115_v16 }
  0xda   :  { %341 = vmatpush3.bf16.msra.mxu1 %v356_v15  ;;  %344 = vmatprep.mubr.msk.bf16.mxu1 %vm363_vm0, %v362_v0 }
  0xdb   :  { %342 = vmatprep.subr.bf16.mxu1 %v362_v0 }
  0xde   :  { %343 = vmatpush3.bf16.msra.mxu1 %v357_v18 }
 0x199   :  { %v177_v20 = vpop.f32.mrf.mxu1 }
 0x19a   :  { %v178_v21 = vadd.f32 %v293_v19, %v177_v20 }
 0x19b   :  { %v338_v22 = vpop.f32.mrf.mxu1 }
 0x19c   :  { %v183_v23 = vmax.f32 %v178_v21, 0.0 }
 0x19d   :  { %v180_v24 = vpop.f32.mrf.mxu1 }
 0x19e   :  { %v184_v25 = vpack.c.bf16 %v183_v23, %v183_v23 }
 0x19f   :  { %v339_v26 = vpop.f32.mrf.mxu1 }
 0x1a0   :  { %345 = vmatmul.mubr.msk.bf16.vlgmr.msra.gmra.mxu1 %vm139_vm2, %v184_v25 }
 0x260   :  { %v247_v29 = vpop.f32.mrf.mxu1 }
 0x261   :  { %v248_v30 = vadd.f32 %v302_v28, %v247_v29 }
 0x262   :  { %v346_v31 = vpop.f32.mrf.mxu1 }
 0x263   :  { %v253_v32 = vmax.f32 %v248_v30, 0.0 }
 0x264   :  { %v250_v33 = vpop.f32.mrf.mxu1 }
 0x265   :  { %v254_v34 = vpack.c.bf16 %v253_v32, %v253_v32 }
 0x266   :  { %v347_v35 = vpop.f32.mrf.mxu1 }
 0x267   :  { %v255_v37 = vunpack.c.l.bf16 %v254_v34 }
 0x269   :  { %v263_v38 = vmul.f32 %v306_v36, %v255_v37 }
 0x26b   :  { %v264_v39 = vsel %vm139_vm2, %v263_v38, 0.0 }
 0x26c   :  { %265 = vadd.xlane.f32.xlu0 %v264_v39 }
 0x2f5   :  { %v266_v41 = vpop.xlane.xlu0 %265 }
 0x2f6   :  { %v274_v42 = vadd.f32 %v307_v40, %v266_v41 }
 0x2f8   :  { %v308_v43 = vmul.f32 -1.442695, %v274_v42 }
 0x2fa   :  { %358 = vpow2.f32 %v308_v43 }
 0x307   :  { %v359_v44 = vpop.eup %358 }
 0x308   :  { %v278_v45 = vadd.f32 1.0, %v359_v44 }
 0x30a   :  { %360 = vrcp.f32 %v278_v45 }
 0x317   :  { %v361_v46 = vpop.eup %360 }
 0x318   :  { %282 = vst.msk [vmem:[%s462_s7] sm:$0xff] %vm281_vm3, %v361_v46 }

// kernel: tpu_custom_call.1
= control target key start
LH: loop header
LB: loop body
LE: loop exit
PB: predicated region body
PF: predicated region fallthrough
CT: control target
= control target key end

     0   :  { %v362_v0 = vmov 0.0   ;;  %vm363_vm0 = vmmov 0   ;;  %vm70_vm1 = vcmask 523264   ;;  %vm139_vm2 = vcmask 261120   ;;  %s455_s1 = inlined_call_operand.vmem [shape: bf16[64,32], index: 1, kind: input, shape index: {}]   ;;  %s456_s0 = inlined_call_operand.vmem [shape: f32[8,64], index: 0, kind: input, shape index: {}]   ;;  %s457_s3 = inlined_call_operand.vmem [shape: bf16[2,32,32], index: 3, kind: input, shape index: {}]   ;;  %s458_s2 = inlined_call_operand.vmem [shape: f32[1,32], index: 2, kind: input, shape index: {}]   ;;  %s459_s4 = inlined_call_operand.vmem [shape: f32[2,1,32], index: 4, kind: input, shape index: {}]   ;;  %s460_s6 = inlined_call_operand.<no memory space> [shape: f32[1,1], index: 6, kind: input, shape index: {}]   ;;  %s461_s5 = inlined_call_operand.vmem [shape: f32[1,32], index: 5, kind: input, shape index: {}]   ;;  %s462_s7 = inlined_call_operand.vmem [shape: f32[8,1], index: 7, kind: output, shape index: {}]  }
   0x1   :  { %320 = vmatprep.subr.bf16.mxu0 %v362_v0  ;;  %v350_v1 = vld [vmem:[%s455_s1 + $0x18] sm:$0xff]   ;;  %328 = vmatprep.mubr.msk.bf16.mxu0 %vm363_vm0, %v362_v0  ;;  %v351_v2 = vld [vmem:[%s455_s1 + $0x10] sm:$0xff]   ;;  %v352_v3 = vld [vmem:[%s455_s1 + $0x8] sm:$0xff]   ;;  %v12_v27 = vstv %s460_s6  ;;  %vm281_vm3 = vcmask 7168  }
   0x2   :  { %332 = vmatprep.subr.bf16.mxu1 %v362_v0  ;;  %336 = vmatprep.mubr.msk.bf16.mxu1 %vm363_vm0, %v362_v0  ;;  %v353_v4 = vld [vmem:[%s455_s1] sm:$0xff]   ;;  %v354_v7 = vld [vmem:[%s457_s3 + $0x8] sm:$0xff]   ;;  %v356_v15 = vld [vmem:[%s457_s3 + $0x18] sm:$0xff]   ;;  %13 = vst [vmem:[#allocation2] sm:$0x1] %v12_v27 }
   0x3   :  { %321 = vmatpush3.bf16.msra.mxu0 %v350_v1  ;;  %v29_v5 = vld [vmem:[%s456_s0] sm:$0xff]  ;;  %333 = vmatpush3.bf16.msra.mxu1 %v354_v7  ;;  %v357_v18 = vld [vmem:[%s457_s3 + $0x10] sm:$0xff]  }
   0x4   :  { %322 = vmatprep.subr.bf16.mxu0 %v362_v0  ;;  %v30_v6 = vpack.c.bf16 %v29_v5, %v29_v5  ;;  %334 = vmatprep.subr.bf16.mxu1 %v362_v0  ;;  %v355_v8 = vld [vmem:[%s457_s3] sm:$0xff]  }
   0x5   :  { %v287_v9 = vld [vmem:[%s458_s2] ss:$0 sm:$0xff]  ;;  %v302_v28 = vld [vmem:[%s459_s4 + $0x1] ss:$0 sm:$0xff] }
   0x6   :  { %v293_v19 = vld [vmem:[%s459_s4] ss:$0 sm:$0xff] }
   0x7   :  { %323 = vmatpush3.bf16.msra.mxu0 %v351_v2  ;;  %335 = vmatpush3.bf16.msra.mxu1 %v355_v8  ;;  %v306_v36 = vld [vmem:[%s461_s5] ss:$0 sm:$0xff] }
   0x8   :  { %324 = vmatprep.subr.bf16.mxu0 %v362_v0  ;;  %340 = vmatprep.subr.bf16.mxu1 %v362_v0 }
   0x9   :  { %v307_v40 = vld [vmem:[#allocation2] ss:$0 sm:$0xff] }
   0xb   :  { %325 = vmatpush3.bf16.msra.mxu0 %v352_v3 }
   0xc   :  { %326 = vmatprep.subr.bf16.mxu0 %v362_v0 }
   0xf   :  { %327 = vmatpush3.bf16.msra.mxu0 %v353_v4 }
  0x12   :  { %329 = vmatmul.mubr.msk.bf16.vlgmr.msra.gmra.mxu0 %vm70_vm1, %v30_v6 }
  0xd2   :  { %v108_v10 = vpop.f32.mrf.mxu0 }
  0xd3   :  { %v109_v11 = vadd.f32 %v287_v9, %v108_v10 }
  0xd4   :  { %v330_v12 = vpop.f32.mrf.mxu0 }
  0xd5   :  { %v114_v13 = vmax.f32 %v109_v11, 0.0 }
  0xd6   :  { %v111_v14 = vpop.f32.mrf.mxu0 }
  0xd7   :  { %v115_v16 = vpack.c.bf16 %v114_v13, %v114_v13 }
  0xd8   :  { %v331_v17 = vpop.f32.mrf.mxu0 }
  0xd9   :  { %337 = vmatmul.mubr.msk.bf16.vlgmr.msra.gmra.mxu1 %vm139_vm2, %v115_v16 }
  0xda   :  { %341 = vmatpush3.bf16.msra.mxu1 %v356_v15  ;;  %344 = vmatprep.mubr.msk.bf16.mxu1 %vm363_vm0, %v362_v0 }
  0xdb   :  { %342 = vmatprep.subr.bf16.mxu1 %v362_v0 }
  0xde   :  { %343 = vmatpush3.bf16.msra.mxu1 %v357_v18 }
 0x199   :  { %v177_v20 = vpop.f32.mrf.mxu1 }
 0x19a   :  { %v178_v21 = vadd.f32 %v293_v19, %v177_v20 }
 0x19b   :  { %v338_v22 = vpop.f32.mrf.mxu1 }
 0x19c   :  { %v183_v23 = vmax.f32 %v178_v21, 0.0 }
 0x19d   :  { %v180_v24 = vpop.f32.mrf.mxu1 }
 0x19e   :  { %v184_v25 = vpack.c.bf16 %v183_v23, %v183_v23 }
 0x19f   :  { %v339_v26 = vpop.f32.mrf.mxu1 }
 0x1a0   :  { %345 = vmatmul.mubr.msk.bf16.vlgmr.msra.gmra.mxu1 %vm139_vm2, %v184_v25 }
 0x260   :  { %v247_v29 = vpop.f32.mrf.mxu1 }
 0x261   :  { %v248_v30 = vadd.f32 %v302_v28, %v247_v29 }
 0x262   :  { %v346_v31 = vpop.f32.mrf.mxu1 }
 0x263   :  { %v253_v32 = vmax.f32 %v248_v30, 0.0 }
 0x264   :  { %v250_v33 = vpop.f32.mrf.mxu1 }
 0x265   :  { %v254_v34 = vpack.c.bf16 %v253_v32, %v253_v32 }
 0x266   :  { %v347_v35 = vpop.f32.mrf.mxu1 }
 0x267   :  { %v255_v37 = vunpack.c.l.bf16 %v254_v34 }
 0x269   :  { %v263_v38 = vmul.f32 %v306_v36, %v255_v37 }
 0x26b   :  { %v264_v39 = vsel %vm139_vm2, %v263_v38, 0.0 }
 0x26c   :  { %265 = vadd.xlane.f32.xlu0 %v264_v39 }
 0x2f5   :  { %v266_v41 = vpop.xlane.xlu0 %265 }
 0x2f6   :  { %v274_v42 = vadd.f32 %v307_v40, %v266_v41 }
 0x2f8   :  { %v308_v43 = vmul.f32 -1.442695, %v274_v42 }
 0x2fa   :  { %358 = vpow2.f32 %v308_v43 }
 0x307   :  { %v359_v44 = vpop.eup %358 }
 0x308   :  { %v278_v45 = vadd.f32 1.0, %v359_v44 }
 0x30a   :  { %360 = vrcp.f32 %v278_v45 }
 0x317   :  { %v361_v46 = vpop.eup %360 }
 0x318   :  { %282 = vst.msk [vmem:[%s462_s7] sm:$0xff] %vm281_vm3, %v361_v46 }

</bundles_post_ra>
